<compile_context>
chip_gen: v7x
topology: tpu7x:2x2x1
jax: 0.10.0
libtpu: 0.0.40
codegen_flags: <defaults>
</compile_context>

<pallas_src>
import functools
import math

import jax
import jax.numpy as jnp
from jax.experimental import pallas as pl
from jax.experimental.pallas import tpu as pltpu

LEAKY_SLOPE = 0.01   # nn.LeakyReLU default
BN_EPS = 1e-5        # nn.BatchNorm1d default


def _softplus(x):
    # numerically stable softplus == torch.nn.Softplus (threshold irrelevant here)
    return jnp.maximum(x, 0.0) + jnp.log(1.0 + jnp.exp(-jnp.abs(x)))


# ----------------------------------------------------------------------------
# Fused kernel: normalize(folded) -> E-member MLP (batched) -> aggregation
# ----------------------------------------------------------------------------
def _fused_kernel(x_ref, w1_ref, w2_ref, wh_ref, pp_ref, out_ref, *,
                  S, E, s_lo, s_hi, min_var, max_var):
    EH1 = w1_ref.shape[1]
    EH2 = w2_ref.shape[1]
    HW = wh_ref.shape[1]
    ES, SS = E * S, S * S
    ESS = E * SS

    x = x_ref[...]                 # [n, S+A]  raw states|actions (norm folded into w1)
    pp = pp_ref[...]               # [8, >=128] packed row parameters (one DMA, one vreg)
    g1, be1 = pp[0:1, :EH1], pp[1:2, :EH1]
    g2, be2 = pp[2:3, :EH2], pp[3:4, :EH2]
    bh = pp[4:5, :HW]
    maxlv = pp[5:6, :ES]
    minlv = pp[6:7, :ES]
    dvar = pp[7:8, :ES]            # diff_std**2, tiled per member

    def bn_lrelu(z, g, b):
        # BatchNorm1d in training mode (module default): batch stats, biased var.
        m = jnp.mean(z, axis=0, keepdims=True)
        v = jnp.mean((z - m) ** 2, axis=0, keepdims=True)
        h = (z - m) * jax.lax.rsqrt(v + BN_EPS) * g + b
        return jnp.where(h >= 0, h, LEAKY_SLOPE * h)          # LeakyReLU

    # ---- layer 1 (members batched along output dim) + layer 2 (block-diag).
    # NOTE: pre-BN biases b1/b2, input-normalization offsets and the mu term
    # are omitted — all are row-constants exactly cancelled by training-mode BN.
    h = bn_lrelu(jnp.dot(x, w1_ref[...], preferred_element_type=jnp.float32), g1, be1)
    h = bn_lrelu(jnp.dot(h, w2_ref[...], preferred_element_type=jnp.float32), g2, be2)

    # ---- single fused heads matmul producing, per batch row:
    #   [0:S]              ensemble mean of *denormalized* member means
    #   [S:S+ES]           per-member logvars
    #   [S+ES:S+ES+ESS]    rep_e(i,j) = d_e[i]   (d_e = member mean - ensemble mean)
    #   [S+ES+ESS:HW]      til_e(i,j) = d_e[j]
    heads = jnp.dot(h, wh_ref[...], preferred_element_type=jnp.float32) + bh

    out_means = heads[:, 0:S]
    logvars = heads[:, S:S + ES]
    rep = heads[:, S + ES:S + ES + ESS]
    til = heads[:, S + ES + ESS:S + ES + 2 * ESS]

    # ---- soft logvar clamping + aleatoric variance (mean over members).
    lv = maxlv - _softplus(maxlv - logvars)
    lv = minlv + _softplus(lv - minlv)
    vars_all = jnp.exp(lv) * dvar                          # [n, E*S]
    alea = vars_all[:, 0:S]
    for e in range(1, E):
        alea = alea + vars_all[:, e * S:(e + 1) * S]
    alea = alea * (1.0 / E)

    # ---- epistemic covariance, flat lane-parallel [n, S*S] layout.
    prod = rep * til                                       # d_e[i]*d_e[j] at col e*SS+i*S+j
    ep = prod[:, 0:SS]
    for e in range(1, E):
        ep = ep + prod[:, e * SS:(e + 1) * SS]
    ep = ep * (1.0 / max(E - 1, 1))

    nxt = jnp.clip(x[:, 0:S] + out_means, s_lo, s_hi)
    ep = jnp.clip(ep, min_var, max_var)                    # full-matrix clamp, as in ref
    alea = jnp.clip(alea, min_var, max_var)

    # one lane-contiguous output slab [n, S + S*S + S]; wrapper splits it.
    out_ref[...] = jnp.concatenate([nxt, ep, alea], axis=1)


# ----------------------------------------------------------------------------
# One-time host-side parameter repacking into the fused-kernel layout
# ----------------------------------------------------------------------------
def _block_diag(blocks):
    E = len(blocks)
    r, c = blocks[0].shape
    out = jnp.zeros((E * r, E * c), jnp.float32)
    for e, b in enumerate(blocks):
        out = out.at[e * r:(e + 1) * r, e * c:(e + 1) * c].set(b)
    return out


def prepare_params(params, diff_mean, diff_std, state_dim, mu_dim, action_dim,
                   state_space, action_space, min_var, max_var):
    f32 = jnp.float32
    E, D, H1 = params["w1"].shape
    H2 = params["w2"].shape[2]
    S, M, A = state_dim, mu_dim, action_dim
    assert D == S + M + A and params["wm"].shape[2] == S

    # ---- layer 1: fold the [-1,1] affine normalization slope into the weights;
    # drop the mu rows / normalization offsets / b1 (row-constants, BN-cancelled).
    a_s = 2.0 / (state_space[1] - state_space[0])
    a_a = 2.0 / (action_space[1] - action_space[0])
    w1 = params["w1"].astype(f32)
    w1_sa = jnp.concatenate([w1[:, :S, :] * a_s, w1[:, S + M:, :] * a_a], axis=1)  # [E,S+A,H1]
    W1 = jnp.transpose(w1_sa, (1, 0, 2)).reshape(S + A, E * H1)

    # ---- layer 2: block-diagonal across members (b2 dropped, BN-cancelled).
    W2 = _block_diag([params["w2"][e].astype(f32) for e in range(E)])

    # ---- fused heads: [ ensemble-mean | logvars | rep deviations | til deviations ].
    dstd = diff_std.reshape(S).astype(f32)
    dmean = diff_mean.reshape(S).astype(f32)
    wm = params["wm"].astype(f32) * dstd[None, None, :]                 # denormalized
    bm = params["bm"].reshape(E, S).astype(f32) * dstd[None, :] + dmean[None, :]

    W_avg = (wm / E).reshape(E * H2, S)            # ensemble mean straight from the MXU
    b_avg = bm.mean(axis=0, keepdims=True)         # [1, S]

    blockcols = jnp.zeros((E, H2, E, S), f32)      # per-member denorm mean head columns
    for e in range(E):
        blockcols = blockcols.at[e, :, e, :].set(wm[e])
    blockcols = blockcols.reshape(E * H2, E, S)
    D_all = blockcols - W_avg.reshape(E * H2, 1, S)   # d_e = member mean - ensemble mean
    d_bias = bm - b_avg                               # [E, S]

    W_rep = jnp.repeat(D_all, S, axis=2).reshape(E * H2, E * S * S)
    W_til = jnp.tile(D_all, (1, 1, S)).reshape(E * H2, E * S * S)
    b_rep = jnp.repeat(d_bias, S, axis=1).reshape(1, E * S * S)
    b_til = jnp.tile(d_bias, (1, S)).reshape(1, E * S * S)

    W_lv = _block_diag([params["wl"][e].astype(f32) for e in range(E)])
    b_lv = params["bl"].reshape(1, E * S).astype(f32)

    WH = jnp.concatenate([W_avg, W_lv, W_rep, W_til], axis=1)
    bh = jnp.concatenate([b_avg, b_lv, b_rep, b_til], axis=1)
    headw = WH.shape[1]
    # Block-batched widths must fit one MXU tile (128 on v5e, 256 on v6e/v7x);
    # demo sizes: 96 / 96 / 112.
    assert max(E * H1, E * H2, headw) <= 128, "block-batched width exceeds one MXU tile"

    # ---- one packed [8, >=128] parameter tile == ONE input DMA for all row params.
    pw = -(-max(E * H1, E * H2, headw, 128) // 128) * 128
    pack = jnp.zeros((8, pw), f32)
    pack = pack.at[0, :E * H1].set(params["g1"].reshape(E * H1).astype(f32))
    pack = pack.at[1, :E * H1].set(params["be1"].reshape(E * H1).astype(f32))
    pack = pack.at[2, :E * H2].set(params["g2"].reshape(E * H2).astype(f32))
    pack = pack.at[3, :E * H2].set(params["be2"].reshape(E * H2).astype(f32))
    pack = pack.at[4, :headw].set(bh.reshape(headw))
    pack = pack.at[5, :E * S].set(params["max_logvar"].reshape(E * S).astype(f32))
    pack = pack.at[6, :E * S].set(params["min_logvar"].reshape(E * S).astype(f32))
    pack = pack.at[7, :E * S].set(jnp.tile(dstd * dstd, (E,)))

    return dict(w1=W1, w2=W2, wh=WH, pack=pack,
                dims=(E, S, M, A, H1, H2),
                state_space=(float(state_space[0]), float(state_space[1])),
                min_var=float(min_var), max_var=float(max_var))


# ----------------------------------------------------------------------------
# Wrapper
# ----------------------------------------------------------------------------
def unknown_dynamics_forward(states, mu, actions, prep):
    # NOTE: `mu` is accepted for API parity but intentionally unused: under
    # training-mode BatchNorm its batch-constant layer-1 contribution is
    # exactly cancelled by the batch-mean subtraction (same as b1/b2).
    # TODO(synk): normalize_inputs / concat_inputs come from an external
    # module; a [-1,1] affine for states/actions with mu passed through, and
    # training-mode BatchNorm (the nn.Module default), are assumed — with
    # eval-mode running stats the mu / bias / offset folds would not hold.
    E, S, M, A, H1, H2 = prep["dims"]
    n = states.shape[0]
    s_lo, s_hi = prep["state_space"]

    x = jnp.concatenate([states.astype(jnp.float32), actions.astype(jnp.float32)], axis=1)
    kernel = functools.partial(
        _fused_kernel, S=S, E=E, s_lo=s_lo, s_hi=s_hi,
        min_var=prep["min_var"], max_var=prep["max_var"])

    def vmem():
        return pl.BlockSpec(memory_space=pltpu.MemorySpace.VMEM)

    out = pl.pallas_call(
        kernel,
        out_shape=jax.ShapeDtypeStruct((n, 2 * S + S * S), jnp.float32),
        in_specs=[vmem() for _ in range(5)],
        out_specs=vmem(),
    )(x, prep["w1"], prep["w2"], prep["wh"], prep["pack"])

    next_states = out[:, :S]
    epistemic = out[:, S:S + S * S].reshape(n, S, S)
    aleatoric = out[:, S + S * S:]
    return next_states, epistemic, aleatoric


# ----------------------------------------------------------------------------
# Deterministic parameter init (matches EnsembleMember.__init__ / init_layers)
# ----------------------------------------------------------------------------
def _xavier_uniform(key, fan_in, fan_out, gain):
    limit = gain * math.sqrt(6.0 / (fan_in + fan_out))
    return jax.random.uniform(key, (fan_in, fan_out), jnp.float32, -limit, limit)


def init_params(key, E, state_dim, mu_dim, action_dim, hidden_dims, min_var, max_var):
    D = state_dim + mu_dim + action_dim
    H1, H2 = hidden_dims
    gain = math.sqrt(2.0)
    keys = jax.random.split(key, E * 4)
    w1 = jnp.stack([_xavier_uniform(keys[4 * e + 0], D, H1, gain) for e in range(E)])
    w2 = jnp.stack([_xavier_uniform(keys[4 * e + 1], H1, H2, gain) for e in range(E)])
    wm = jnp.stack([_xavier_uniform(keys[4 * e + 2], H2, state_dim, gain) for e in range(E)])
    wl = jnp.stack([_xavier_uniform(keys[4 * e + 3], H2, state_dim, gain) for e in range(E)])
    zeros = lambda d: jnp.zeros((E, 1, d), jnp.float32)
    ones = lambda d: jnp.ones((E, 1, d), jnp.float32)
    return dict(
        w1=w1, b1=zeros(H1), g1=ones(H1), be1=zeros(H1),
        w2=w2, b2=zeros(H2), g2=ones(H2), be2=zeros(H2),
        wm=wm, bm=zeros(state_dim),
        wl=wl, bl=zeros(state_dim),
        max_logvar=jnp.full((E, 1, state_dim), math.log(max_var - min_var), jnp.float32),
        min_logvar=jnp.full((E, 1, state_dim), math.log(min_var), jnp.float32),
    )


# ----------------------------------------------------------------------------
# Pure-JAX reference (unfused, per-member) used only for validation
# ----------------------------------------------------------------------------
def _reference_forward(params, states, mu, actions, diff_mean, diff_std,
                       state_space, action_space, min_var, max_var):
    E = params["w1"].shape[0]
    hp = jax.lax.Precision.HIGHEST
    ns = (states - state_space[0]) * (2.0 / (state_space[1] - state_space[0])) - 1.0
    na = (actions - action_space[0]) * (2.0 / (action_space[1] - action_space[0])) - 1.0
    nmu = jnp.broadcast_to(mu.reshape(1, -1), (states.shape[0], mu.shape[-1]))
    inputs = jnp.concatenate([ns, nmu, na], axis=1)

    def bn(h, g, b):
        m = h.mean(axis=0, keepdims=True)
        v = ((h - m) ** 2).mean(axis=0, keepdims=True)
        return (h - m) / jnp.sqrt(v + BN_EPS) * g + b

    lrelu = lambda h: jnp.where(h >= 0, h, LEAKY_SLOPE * h)
    means, vs = [], []
    for e in range(E):
        h = lrelu(bn(jnp.dot(inputs, params["w1"][e], precision=hp) + params["b1"][e],
                     params["g1"][e], params["be1"][e]))
        h = lrelu(bn(jnp.dot(h, params["w2"][e], precision=hp) + params["b2"][e],
                     params["g2"][e], params["be2"][e]))
        mean = jnp.dot(h, params["wm"][e], precision=hp) + params["bm"][e]
        logvar = jnp.dot(h, params["wl"][e], precision=hp) + params["bl"][e]
        lv = params["max_logvar"][e] - jax.nn.softplus(params["max_logvar"][e] - logvar)
        lv = params["min_logvar"][e] + jax.nn.softplus(lv - params["min_logvar"][e])
        means.append(mean)
        vs.append(jnp.exp(lv))
    sm = jnp.stack(means) * diff_std + diff_mean
    out_means = sm.mean(axis=0)
    d = sm - out_means
    ep = jnp.einsum('eni,enj->nij', d, d, precision=hp) / max(E - 1, 1)
    alea = (jnp.stack(vs) * diff_std ** 2).mean(axis=0)
    nxt = jnp.clip(states + out_means, state_space[0], state_space[1])
    return (nxt, jnp.clip(ep, min_var, max_var), jnp.clip(alea, min_var, max_var))


if __name__ == "__main__":
    E, n = 3, 16
    state_dim, mu_dim, action_dim = 4, 8, 2
    hidden_dims = [32, 32]
    min_var, max_var = 0.001 ** 2, 1.0            # as set in UnknownDynamics.__init__
    state_space, action_space = (0.0, 1.0), (-1.0, 1.0)

    key = jax.random.PRNGKey(0)
    kp, ks, km, ka, kd = jax.random.split(key, 5)
    params = init_params(kp, E, state_dim, mu_dim, action_dim, hidden_dims,
                         min_var, max_var)

    states = jax.random.uniform(ks, (n, state_dim), jnp.float32, 0.0, 1.0)
    mu_raw = jax.random.uniform(km, (mu_dim,), jnp.float32, 0.0, 1.0)
    mu = mu_raw / mu_raw.sum()
    actions = jax.random.uniform(ka, (n, action_dim), jnp.float32, -1.0, 1.0)

    # Synthetic diff statistics (UnknownDynamics.update_diffs builds these from data).
    diffs = 0.05 + 0.1 * jax.random.normal(kd, (64, state_dim), jnp.float32)
    diff_mean = diffs.mean(axis=0)
    diff_std = jnp.sqrt(((diffs - diff_mean) ** 2).sum(axis=0) / (diffs.shape[0] - 1))

    prep = prepare_params(params, diff_mean, diff_std, state_dim, mu_dim, action_dim,
                          state_space, action_space, min_var, max_var)

    next_states, epistemic, aleatoric = unknown_dynamics_forward(states, mu, actions, prep)
    jax.block_until_ready((next_states, epistemic, aleatoric))

    assert next_states.shape == (n, state_dim)
    assert epistemic.shape == (n, state_dim, state_dim)
    assert aleatoric.shape == (n, state_dim)
    assert bool(jnp.isfinite(next_states).all())
    assert bool(jnp.isfinite(epistemic).all())
    assert bool(jnp.isfinite(aleatoric).all())

    # Validate the algebraic folds against the unfused pure-JAX reference.
    ref_next, ref_ep, ref_alea = _reference_forward(
        params, states, mu, actions, diff_mean, diff_std,
        state_space, action_space, min_var, max_var)
    assert bool(jnp.allclose(next_states, ref_next, rtol=2e-2, atol=2e-4))
    assert bool(jnp.allclose(epistemic, ref_ep, rtol=2e-2, atol=2e-4))
    assert bool(jnp.allclose(aleatoric, ref_alea, rtol=2e-2, atol=2e-4))

    print("KERNEL_OK")
</pallas_src>

<mosaic_0001>
module attributes {stable_mosaic.version = 11 : i64} {
  func.func @_fused_kernel(%arg0: memref<16x6xf32, #tpu.memory_space<vmem>>, %arg1: memref<6x96xf32, #tpu.memory_space<vmem>>, %arg2: memref<96x96xf32, #tpu.memory_space<vmem>>, %arg3: memref<96x112xf32, #tpu.memory_space<vmem>>, %arg4: memref<8x128xf32, #tpu.memory_space<vmem>>, %arg5: memref<16x24xf32, #tpu.memory_space<vmem>>) attributes {dimension_semantics = [], scalar_prefetch = 0 : i64, scratch_operands = 0 : i64, tpu.core_type = #tpu.core_type<tc>} {
    %c0 = arith.constant 0 : index
    %c0_0 = arith.constant 0 : index
    %0 = vector.load %arg0[%c0, %c0_0] : memref<16x6xf32, #tpu.memory_space<vmem>>, vector<16x6xf32>
    %c0_1 = arith.constant 0 : index
    %c0_2 = arith.constant 0 : index
    %1 = vector.load %arg4[%c0_1, %c0_2] : memref<8x128xf32, #tpu.memory_space<vmem>>, vector<8x128xf32>
    %2 = vector.extract_strided_slice %1 {offsets = [0, 0], sizes = [1, 96], strides = [1, 1]} : vector<8x128xf32> to vector<1x96xf32>
    %3 = vector.extract_strided_slice %1 {offsets = [1, 0], sizes = [1, 96], strides = [1, 1]} : vector<8x128xf32> to vector<1x96xf32>
    %4 = vector.extract_strided_slice %1 {offsets = [2, 0], sizes = [1, 96], strides = [1, 1]} : vector<8x128xf32> to vector<1x96xf32>
    %5 = vector.extract_strided_slice %1 {offsets = [3, 0], sizes = [1, 96], strides = [1, 1]} : vector<8x128xf32> to vector<1x96xf32>
    %6 = vector.extract_strided_slice %1 {offsets = [4, 0], sizes = [1, 112], strides = [1, 1]} : vector<8x128xf32> to vector<1x112xf32>
    %7 = vector.extract_strided_slice %1 {offsets = [5, 0], sizes = [1, 12], strides = [1, 1]} : vector<8x128xf32> to vector<1x12xf32>
    %8 = vector.extract_strided_slice %1 {offsets = [6, 0], sizes = [1, 12], strides = [1, 1]} : vector<8x128xf32> to vector<1x12xf32>
    %9 = vector.extract_strided_slice %1 {offsets = [7, 0], sizes = [1, 12], strides = [1, 1]} : vector<8x128xf32> to vector<1x12xf32>
    %c0_3 = arith.constant 0 : index
    %c0_4 = arith.constant 0 : index
    %10 = vector.load %arg1[%c0_3, %c0_4] : memref<6x96xf32, #tpu.memory_space<vmem>>, vector<6x96xf32>
    %cst = arith.constant dense<0.000000e+00> : vector<16x96xf32>
    %11 = tpu.matmul %0, %10, %cst {dimension_numbers = #tpu.dot_dimension_numbers<[1], [0], [0], [1], [0, 0, 1, 1], [], []>} : vector<16x6xf32>, vector<6x96xf32>, vector<16x96xf32> -> vector<16x96xf32>
    %cst_5 = arith.constant dense<0.000000e+00> : vector<96xf32>
    %12 = vector.multi_reduction <add>, %11, %cst_5 [0] : vector<16x96xf32> to vector<96xf32>
    %13 = vector.shape_cast %12 : vector<96xf32> to vector<1x96xf32>
    %cst_6 = arith.constant 1.600000e+01 : f32
    %14 = vector.broadcast %cst_6 : f32 to vector<1x96xf32>
    %15 = arith.divf %13, %14 : vector<1x96xf32>
    %16 = vector.broadcast %15 : vector<1x96xf32> to vector<16x96xf32>
    %17 = arith.subf %11, %16 : vector<16x96xf32>
    %18 = arith.mulf %17, %17 : vector<16x96xf32>
    %cst_7 = arith.constant dense<0.000000e+00> : vector<96xf32>
    %19 = vector.multi_reduction <add>, %18, %cst_7 [0] : vector<16x96xf32> to vector<96xf32>
    %20 = vector.shape_cast %19 : vector<96xf32> to vector<1x96xf32>
    %cst_8 = arith.constant 1.600000e+01 : f32
    %21 = vector.broadcast %cst_8 : f32 to vector<1x96xf32>
    %22 = arith.divf %20, %21 : vector<1x96xf32>
    %23 = vector.broadcast %15 : vector<1x96xf32> to vector<16x96xf32>
    %24 = arith.subf %11, %23 : vector<16x96xf32>
    %cst_9 = arith.constant 9.99999974E-6 : f32
    %25 = vector.broadcast %cst_9 : f32 to vector<1x96xf32>
    %26 = arith.addf %22, %25 : vector<1x96xf32>
    %27 = math.rsqrt %26 : vector<1x96xf32>
    %28 = vector.broadcast %27 : vector<1x96xf32> to vector<16x96xf32>
    %29 = arith.mulf %24, %28 : vector<16x96xf32>
    %30 = vector.broadcast %2 : vector<1x96xf32> to vector<16x96xf32>
    %31 = arith.mulf %29, %30 : vector<16x96xf32>
    %32 = vector.broadcast %3 : vector<1x96xf32> to vector<16x96xf32>
    %33 = arith.addf %31, %32 : vector<16x96xf32>
    %cst_10 = arith.constant 0.000000e+00 : f32
    %34 = vector.broadcast %cst_10 : f32 to vector<16x96xf32>
    %35 = arith.cmpf oge, %33, %34 : vector<16x96xf32>
    %cst_11 = arith.constant 0.00999999977 : f32
    %36 = vector.broadcast %cst_11 : f32 to vector<16x96xf32>
    %37 = arith.mulf %36, %33 : vector<16x96xf32>
    %38 = arith.select %35, %33, %37 : vector<16x96xi1>, vector<16x96xf32>
    %c0_12 = arith.constant 0 : index
    %c0_13 = arith.constant 0 : index
    %39 = vector.load %arg2[%c0_12, %c0_13] : memref<96x96xf32, #tpu.memory_space<vmem>>, vector<96x96xf32>
    %cst_14 = arith.constant dense<0.000000e+00> : vector<16x96xf32>
    %40 = tpu.matmul %38, %39, %cst_14 {dimension_numbers = #tpu.dot_dimension_numbers<[1], [0], [0], [1], [0, 0, 1, 1], [], []>} : vector<16x96xf32>, vector<96x96xf32>, vector<16x96xf32> -> vector<16x96xf32>
    %cst_15 = arith.constant dense<0.000000e+00> : vector<96xf32>
    %41 = vector.multi_reduction <add>, %40, %cst_15 [0] : vector<16x96xf32> to vector<96xf32>
    %42 = vector.shape_cast %41 : vector<96xf32> to vector<1x96xf32>
    %cst_16 = arith.constant 1.600000e+01 : f32
    %43 = vector.broadcast %cst_16 : f32 to vector<1x96xf32>
    %44 = arith.divf %42, %43 : vector<1x96xf32>
    %45 = vector.broadcast %44 : vector<1x96xf32> to vector<16x96xf32>
    %46 = arith.subf %40, %45 : vector<16x96xf32>
    %47 = arith.mulf %46, %46 : vector<16x96xf32>
    %cst_17 = arith.constant dense<0.000000e+00> : vector<96xf32>
    %48 = vector.multi_reduction <add>, %47, %cst_17 [0] : vector<16x96xf32> to vector<96xf32>
    %49 = vector.shape_cast %48 : vector<96xf32> to vector<1x96xf32>
    %cst_18 = arith.constant 1.600000e+01 : f32
    %50 = vector.broadcast %cst_18 : f32 to vector<1x96xf32>
    %51 = arith.divf %49, %50 : vector<1x96xf32>
    %52 = vector.broadcast %44 : vector<1x96xf32> to vector<16x96xf32>
    %53 = arith.subf %40, %52 : vector<16x96xf32>
    %cst_19 = arith.constant 9.99999974E-6 : f32
    %54 = vector.broadcast %cst_19 : f32 to vector<1x96xf32>
    %55 = arith.addf %51, %54 : vector<1x96xf32>
    %56 = math.rsqrt %55 : vector<1x96xf32>
    %57 = vector.broadcast %56 : vector<1x96xf32> to vector<16x96xf32>
    %58 = arith.mulf %53, %57 : vector<16x96xf32>
    %59 = vector.broadcast %4 : vector<1x96xf32> to vector<16x96xf32>
    %60 = arith.mulf %58, %59 : vector<16x96xf32>
    %61 = vector.broadcast %5 : vector<1x96xf32> to vector<16x96xf32>
    %62 = arith.addf %60, %61 : vector<16x96xf32>
    %cst_20 = arith.constant 0.000000e+00 : f32
    %63 = vector.broadcast %cst_20 : f32 to vector<16x96xf32>
    %64 = arith.cmpf oge, %62, %63 : vector<16x96xf32>
    %cst_21 = arith.constant 0.00999999977 : f32
    %65 = vector.broadcast %cst_21 : f32 to vector<16x96xf32>
    %66 = arith.mulf %65, %62 : vector<16x96xf32>
    %67 = arith.select %64, %62, %66 : vector<16x96xi1>, vector<16x96xf32>
    %c0_22 = arith.constant 0 : index
    %c0_23 = arith.constant 0 : index
    %68 = vector.load %arg3[%c0_22, %c0_23] : memref<96x112xf32, #tpu.memory_space<vmem>>, vector<96x112xf32>
    %cst_24 = arith.constant dense<0.000000e+00> : vector<16x112xf32>
    %69 = tpu.matmul %67, %68, %cst_24 {dimension_numbers = #tpu.dot_dimension_numbers<[1], [0], [0], [1], [0, 0, 1, 1], [], []>} : vector<16x96xf32>, vector<96x112xf32>, vector<16x112xf32> -> vector<16x112xf32>
    %70 = vector.broadcast %6 : vector<1x112xf32> to vector<16x112xf32>
    %71 = arith.addf %69, %70 : vector<16x112xf32>
    %72 = vector.extract_strided_slice %71 {offsets = [0, 0], sizes = [16, 4], strides = [1, 1]} : vector<16x112xf32> to vector<16x4xf32>
    %73 = vector.extract_strided_slice %71 {offsets = [0, 4], sizes = [16, 12], strides = [1, 1]} : vector<16x112xf32> to vector<16x12xf32>
    %74 = vector.extract_strided_slice %71 {offsets = [0, 16], sizes = [16, 48], strides = [1, 1]} : vector<16x112xf32> to vector<16x48xf32>
    %75 = vector.extract_strided_slice %71 {offsets = [0, 64], sizes = [16, 48], strides = [1, 1]} : vector<16x112xf32> to vector<16x48xf32>
    %76 = vector.broadcast %7 : vector<1x12xf32> to vector<16x12xf32>
    %77 = arith.subf %76, %73 : vector<16x12xf32>
    %cst_25 = arith.constant 0.000000e+00 : f32
    %78 = vector.broadcast %cst_25 : f32 to vector<16x12xf32>
    %79 = arith.maximumf %77, %78 : vector<16x12xf32>
    %80 = math.absf %77 : vector<16x12xf32>
    %cst_26 = arith.constant 0.000000e+00 : f32
    %81 = vector.broadcast %cst_26 : f32 to vector<16x12xf32>
    %82 = arith.subf %81, %80 : vector<16x12xf32>
    %83 = math.exp %82 : vector<16x12xf32>
    %cst_27 = arith.constant 1.000000e+00 : f32
    %84 = vector.broadcast %cst_27 : f32 to vector<16x12xf32>
    %85 = arith.addf %84, %83 : vector<16x12xf32>
    %86 = math.log %85 : vector<16x12xf32>
    %87 = arith.addf %79, %86 : vector<16x12xf32>
    %88 = vector.broadcast %7 : vector<1x12xf32> to vector<16x12xf32>
    %89 = arith.subf %88, %87 : vector<16x12xf32>
    %90 = vector.broadcast %8 : vector<1x12xf32> to vector<16x12xf32>
    %91 = arith.subf %89, %90 : vector<16x12xf32>
    %cst_28 = arith.constant 0.000000e+00 : f32
    %92 = vector.broadcast %cst_28 : f32 to vector<16x12xf32>
    %93 = arith.maximumf %91, %92 : vector<16x12xf32>
    %94 = math.absf %91 : vector<16x12xf32>
    %cst_29 = arith.constant 0.000000e+00 : f32
    %95 = vector.broadcast %cst_29 : f32 to vector<16x12xf32>
    %96 = arith.subf %95, %94 : vector<16x12xf32>
    %97 = math.exp %96 : vector<16x12xf32>
    %cst_30 = arith.constant 1.000000e+00 : f32
    %98 = vector.broadcast %cst_30 : f32 to vector<16x12xf32>
    %99 = arith.addf %98, %97 : vector<16x12xf32>
    %100 = math.log %99 : vector<16x12xf32>
    %101 = arith.addf %93, %100 : vector<16x12xf32>
    %102 = vector.broadcast %8 : vector<1x12xf32> to vector<16x12xf32>
    %103 = arith.addf %102, %101 : vector<16x12xf32>
    %104 = math.exp %103 : vector<16x12xf32>
    %105 = vector.broadcast %9 : vector<1x12xf32> to vector<16x12xf32>
    %106 = arith.mulf %104, %105 : vector<16x12xf32>
    %107 = vector.extract_strided_slice %106 {offsets = [0, 0], sizes = [16, 4], strides = [1, 1]} : vector<16x12xf32> to vector<16x4xf32>
    %108 = vector.extract_strided_slice %106 {offsets = [0, 4], sizes = [16, 4], strides = [1, 1]} : vector<16x12xf32> to vector<16x4xf32>
    %109 = arith.addf %107, %108 : vector<16x4xf32>
    %110 = vector.extract_strided_slice %106 {offsets = [0, 8], sizes = [16, 4], strides = [1, 1]} : vector<16x12xf32> to vector<16x4xf32>
    %111 = arith.addf %109, %110 : vector<16x4xf32>
    %cst_31 = arith.constant 0.333333343 : f32
    %112 = vector.broadcast %cst_31 : f32 to vector<16x4xf32>
    %113 = arith.mulf %111, %112 : vector<16x4xf32>
    %114 = arith.mulf %74, %75 : vector<16x48xf32>
    %115 = vector.extract_strided_slice %114 {offsets = [0, 0], sizes = [16, 16], strides = [1, 1]} : vector<16x48xf32> to vector<16x16xf32>
    %116 = vector.extract_strided_slice %114 {offsets = [0, 16], sizes = [16, 16], strides = [1, 1]} : vector<16x48xf32> to vector<16x16xf32>
    %117 = arith.addf %115, %116 : vector<16x16xf32>
    %118 = vector.extract_strided_slice %114 {offsets = [0, 32], sizes = [16, 16], strides = [1, 1]} : vector<16x48xf32> to vector<16x16xf32>
    %119 = arith.addf %117, %118 : vector<16x16xf32>
    %cst_32 = arith.constant 5.000000e-01 : f32
    %120 = vector.broadcast %cst_32 : f32 to vector<16x16xf32>
    %121 = arith.mulf %119, %120 : vector<16x16xf32>
    %122 = vector.extract_strided_slice %0 {offsets = [0, 0], sizes = [16, 4], strides = [1, 1]} : vector<16x6xf32> to vector<16x4xf32>
    %123 = arith.addf %122, %72 : vector<16x4xf32>
    %cst_33 = arith.constant 0.000000e+00 : f32
    %cst_34 = arith.constant 1.000000e+00 : f32
    %124 = vector.broadcast %cst_33 : f32 to vector<16x4xf32>
    %125 = arith.maximumf %124, %123 : vector<16x4xf32>
    %126 = vector.broadcast %cst_34 : f32 to vector<16x4xf32>
    %127 = arith.minimumf %126, %125 : vector<16x4xf32>
    %cst_35 = arith.constant 9.99999997E-7 : f32
    %cst_36 = arith.constant 1.000000e+00 : f32
    %128 = vector.broadcast %cst_35 : f32 to vector<16x16xf32>
    %129 = arith.maximumf %128, %121 : vector<16x16xf32>
    %130 = vector.broadcast %cst_36 : f32 to vector<16x16xf32>
    %131 = arith.minimumf %130, %129 : vector<16x16xf32>
    %cst_37 = arith.constant 9.99999997E-7 : f32
    %cst_38 = arith.constant 1.000000e+00 : f32
    %132 = vector.broadcast %cst_37 : f32 to vector<16x4xf32>
    %133 = arith.maximumf %132, %113 : vector<16x4xf32>
    %134 = vector.broadcast %cst_38 : f32 to vector<16x4xf32>
    %135 = arith.minimumf %134, %133 : vector<16x4xf32>
    %136 = tpu.concatenate %127, %131, %135 in 1 : vector<16x4xf32>, vector<16x16xf32>, vector<16x4xf32> -> vector<16x24xf32>
    %c0_39 = arith.constant 0 : index
    %c0_40 = arith.constant 0 : index
    %137 = vector.load %arg5[%c0_39, %c0_40] : memref<16x24xf32, #tpu.memory_space<vmem>>, vector<16x24xf32>
    tpu.vector_store %arg5[%c0_39, %c0_40], %136 {strides = array<i32>} : memref<16x24xf32, #tpu.memory_space<vmem>>, vector<16x24xf32>,
    return
  }
}

</mosaic_0001>

<bundles_post_ra>
// kernel: tpu_custom_call.1
= control target key start
LH: loop header
LB: loop body
LE: loop exit
PB: predicated region body
PF: predicated region fallthrough
CT: control target
= control target key end

     0   :  { %10 = vsyncpa [#allocation3], 0  ;;  %s1016_s0 = inlined_call_operand.vmem [shape: f32[16,6], index: 0, kind: input, shape index: {}]   ;;  %s1017_s1 = inlined_call_operand.vmem [shape: f32[6,96], index: 1, kind: input, shape index: {}]   ;;  %s1018_s2 = inlined_call_operand.hbm [shape: f32[96,96], index: 2, kind: input, shape index: {}]   ;;  %s1019_s3 = inlined_call_operand.hbm [shape: f32[96,112], index: 3, kind: input, shape index: {}]   ;;  %s1020_s4 = inlined_call_operand.vmem [shape: f32[8,128], index: 4, kind: input, shape index: {}]   ;;  %s1021_s5 = inlined_call_operand.hbm [shape: f32[16,24], index: 5, kind: output, shape index: {}]  }
   0x1   :  { %11 = vsyncpa [#allocation6], 0 }
   0x2   :  { %12 = vsyncpa [#allocation4], 0  ;;  %s851_s18 = smov [#allocation2]   ;;  %s779_s22 = scalar_lea.hbm %s1018_s2, 1536 }
   0x3   :  { %s22_s19 = sshll.u32 %s851_s18, 4  ;;  %p780_p0 = scmp.ne.s32.totalorder %s1018_s2, %s779_s22  ;;  %s23_s19 = int_to_ptr.vmem [resolvable:$true] %s22_s19 }
   0x4   :  { %p783_p1 = scmp.lt.u32.totalorder %s779_s22, %s1018_s2 }
   0x6   :  { %p785_p2 = pnand %p783_p1, %p780_p0 }
   0x8   :  { %788 = shalt.err (!%p785_p2)
}
   0x9   :  { %s789_s27 = scalar_lea.vmem %s23_s19, 1536  ;;  %p794_p4 = scmp.lt.s32.totalorder %s23_s19, %s23_s19 }
   0xa   :  { %p790_p3 = scmp.ne.s32.totalorder %s23_s19, %s789_s27  ;;  %p795_p5 = scmp.lt.s32.totalorder %s789_s27, %s789_s27 }
   0xc   :  { %p796_p6 = por %p795_p5, %p794_p4 }
   0xe   :  { %p797_p7 = pnand %p796_p6, %p790_p3 }
  0x10   :  { %800 = shalt.err (!%p797_p7)
}
  0x11   :  { %s852_s28 = smov 128   ;;  %s853_s29 = smov 8  }
  0x12   :  { %28 = dma.hbm_to_vmem [thread:$0]  %s1018_s2, 1536, %s23_s19, [#allocation3], %s852_s28, %s852_s28, %s853_s29  }
  0x13   :  { %s854_s7 = smov [#allocation5]   ;;  %s801_s11 = scalar_lea.hbm %s1019_s3, 1536 }
  0x14   :  { %s34_s8 = sshll.u32 %s854_s7, 4  ;;  %p802_p8 = scmp.ne.s32.totalorder %s1019_s3, %s801_s11  ;;  %s35_s8 = int_to_ptr.vmem [resolvable:$true] %s34_s8 }
  0x15   :  { %p805_p9 = scmp.lt.u32.totalorder %s801_s11, %s1019_s3 }
  0x17   :  { %p807_p10 = pnand %p805_p9, %p802_p8 }
  0x19   :  { %810 = shalt.err (!%p807_p10)
}
  0x1a   :  { %s811_s16 = scalar_lea.vmem %s35_s8, 1536  ;;  %p816_p12 = scmp.lt.s32.totalorder %s35_s8, %s35_s8 }
  0x1b   :  { %p812_p11 = scmp.ne.s32.totalorder %s35_s8, %s811_s16  ;;  %p817_p13 = scmp.lt.s32.totalorder %s811_s16, %s811_s16 }
  0x1d   :  { %p818_p0 = por %p817_p13, %p816_p12 }
  0x1f   :  { %p819_p1 = pnand %p818_p0, %p812_p11 }
  0x21   :  { %822 = shalt.err (!%p819_p1)
}
  0x22   :  { %40 = dma.hbm_to_vmem [thread:$0]  %s1019_s3, 1536, %s35_s8, [#allocation6], %s852_s28, %s852_s28, %s853_s29  }
  0x23   :  { %845 = dma.done.wait [#allocation3], 1536  }
  0x24   :  { %846 = vsyncadd [#allocation3], 4294965760 }
  0x25   :  { %847 = dma.done.wait [#allocation6], 1536  }
  0x26   :  { %848 = vsyncadd [#allocation6], 4294965760  ;;  %vm60_vm0 = vcmask 1045504   ;;  %vm53_vm1 = vcmask 48128   ;;  %v52_v0 = vld [vmem:[%s1017_s1] sm:$0x3f]  ;;  %v169_v47 = vlaneseq }
  0x27   :  { %v929_v1 = vld [vmem:[%s1016_s0] sm:$0xff]  ;;  %v934_v2 = vld [vmem:[%s1016_s0 + $0x8] sm:$0xff]  ;;  %636 = vmatprep.subr.msk.mxu0 %vm60_vm0, %v52_v0  ;;  %v189_v6 = vld [vmem:[#allocation2 + $0x10] sm:$0xff]  ;;  %vm139_vm2 = vcmask 785408   ;;  %s855_s3 = smov 80   ;;  %s857_s24 = smov 112  }
  0x28   :  { %638 = vmatprep.mubr.msk.f32.mxu0 %vm53_vm1, %v929_v1  ;;  %637 = vmatpush3.msk.msra.mxu0 %vm60_vm0, %v52_v0  ;;  %v187_v3 = vld [vmem:[#allocation2] sm:$0xff]  ;;  %v188_v4 = vld [vmem:[#allocation2 + $0x8] sm:$0xff]  ;;  %v190_v7 = vld [vmem:[#allocation2 + $0x18] sm:$0xff]  ;;  %v942_v49 = vshrl.u32 %v169_v47, 7  ;;  %s858_s25 = smov 96   ;;  %s859_s26 = smov 120  }
  0x29   :  { %639 = vmatmul.mubr.msk.f32.vlgmr.msra.gmra.mrb[0].mxu0 %vm53_vm1, %v934_v2  ;;  %v695_v5 = vpack.c.bf16 %v188_v4, %v187_v3  ;;  %v699_v8 = vpack.c.bf16 %v190_v7, %v189_v6  ;;  %v191_v9 = vld [vmem:[#allocation2 + $0x20] sm:$0xff]  ;;  %v192_v10 = vld [vmem:[#allocation2 + $0x28] sm:$0xff]  ;;  %v193_v12 = vld [vmem:[#allocation2 + $0x30] sm:$0xff]  ;;  %s860_s27 = smov 116   ;;  %s861_s30 = smov 20   ;;  %vm571_vm7 = vcmask 31744  }
  0x2a   :  { %v703_v11 = vpack.c.bf16 %v192_v10, %v191_v9  ;;  %v194_v13 = vld [vmem:[#allocation2 + $0x38] sm:$0xff]  ;;  %v195_v15 = vld [vmem:[#allocation2 + $0x40] sm:$0xff]  ;;  %v196_v16 = vld [vmem:[#allocation2 + $0x48] sm:$0xff]  ;;  %v171_v50 = vsub.s32 0, %v942_v49  ;;  %v177_v52 = vsub.s32 1, %v942_v49  ;;  %vm574_vm8 = vcmask 162816  }
  0x2b   :  { %696 = vmatprep.subr.bf16.mxu1 %v695_v5  ;;  %v707_v14 = vpack.c.bf16 %v194_v13, %v193_v12  ;;  %v711_v17 = vpack.c.bf16 %v196_v16, %v195_v15  ;;  %v197_v18 = vld [vmem:[#allocation2 + $0x50] sm:$0xff]  ;;  %v198_v19 = vld [vmem:[#allocation2 + $0x58] sm:$0xff]  ;;  %v948_v51 = vld [vmem:[%s1020_s4] sm:$0xff]  ;;  %s856_s4 = smov 124   ;;  %vm577_vm9 = vcmask 195584   ;;  %s862_s6 = smov [#allocation7]  }
  0x2c   :  { %698 = vmatpush3.bf16.msra.mxu1 %v695_v5  ;;  %v715_v20 = vpack.c.bf16 %v198_v19, %v197_v18  ;;  %v172_v53 = vrot.slane %v948_v51, %v171_v50  ;;  %v178_v57 = vrot.slane %v948_v51, %v177_v52  ;;  %v326_v4 = vld [vmem:[#allocation5] sm:$0xff]  ;;  %v327_v5 = vld [vmem:[#allocation5 + $0x8] sm:$0xff]  ;;  %v328_v7 = vld [vmem:[#allocation5 + $0x10] sm:$0xff]  ;;  %v310_v50 = vsub.s32 2, %v942_v49  ;;  %s585_s7 = sshll.u32 %s862_s6, 4  ;;  %s586_s7 = int_to_ptr.vmem [resolvable:$true] %s585_s7 }
  0x2d   :  { %700 = vmatprep.subr.bf16.mxu1 %v699_v8  ;;  %v719_v6 = vpack.c.bf16 %v327_v5, %v326_v4  ;;  %v330_v10 = vld [vmem:[#allocation5 + $0x20] sm:$0xff]  ;;  %v332_v13 = vld [vmem:[#allocation5 + $0x30] sm:$0xff]  ;;  %v316_v52 = vsub.s32 3, %v942_v49  ;;  %v340_v4 = vsub.s32 4, %v942_v49  ;;  %s823_s8 = scalar_lea.vmem %s586_s7, 256  ;;  %p828_p3 = scmp.lt.s32.totalorder %s586_s7, %s586_s7 }
  0x2e   :  { %v334_v16 = vld [vmem:[#allocation5 + $0x40] sm:$0xff]  ;;  %v336_v19 = vld [vmem:[#allocation5 + $0x50] sm:$0xff]  ;;  %p824_p2 = scmp.ne.s32.totalorder %s586_s7, %s823_s8  ;;  %p829_p4 = scmp.lt.s32.totalorder %s823_s8, %s823_s8 }
  0x2f   :  { %720 = vmatprep.subr.bf16.mxu0 %v719_v6  ;;  %v341_v5 = vrot.slane %v948_v51, %v340_v4 }
  0x30   :  { %702 = vmatpush3.bf16.msra.mxu1 %v699_v8  ;;  %722 = vmatpush3.bf16.msra.mxu0 %v719_v6  ;;  %v329_v8 = vld [vmem:[#allocation5 + $0x18] sm:$0xff]  ;;  %p830_p5 = por %p829_p4, %p828_p3 }
  0x31   :  { %704 = vmatprep.subr.bf16.mxu1 %v703_v11  ;;  %v723_v9 = vpack.c.bf16 %v329_v8, %v328_v7 }
  0x32   :  { %p831_p6 = pnand %p830_p5, %p824_p2 }
  0x33   :  { %724 = vmatprep.subr.bf16.mxu0 %v723_v9 }
  0x34   :  { %706 = vmatpush3.bf16.msra.mxu1 %v703_v11  ;;  %726 = vmatpush3.bf16.msra.mxu0 %v723_v9  ;;  %v331_v11 = vld [vmem:[#allocation5 + $0x28] sm:$0xff] }
  0x35   :  { %708 = vmatprep.subr.bf16.mxu1 %v707_v14  ;;  %v727_v12 = vpack.c.bf16 %v331_v11, %v330_v10  ;;  %v425_v10 = vsub.s32 5, %v942_v49 }
  0x37   :  { %728 = vmatprep.subr.bf16.mxu0 %v727_v12  ;;  %v426_v11 = vrot.slane %v948_v51, %v425_v10 }
  0x38   :  { %710 = vmatpush3.bf16.msra.mxu1 %v707_v14  ;;  %730 = vmatpush3.bf16.msra.mxu0 %v727_v12  ;;  %v333_v14 = vld [vmem:[#allocation5 + $0x38] sm:$0xff] }
  0x39   :  { %712 = vmatprep.subr.bf16.mxu1 %v711_v17  ;;  %v731_v15 = vpack.c.bf16 %v333_v14, %v332_v13 }
  0x3b   :  { %732 = vmatprep.subr.bf16.mxu0 %v731_v15 }
  0x3c   :  { %714 = vmatpush3.bf16.msra.mxu1 %v711_v17  ;;  %734 = vmatpush3.bf16.msra.mxu0 %v731_v15  ;;  %v335_v17 = vld [vmem:[#allocation5 + $0x48] sm:$0xff] }
  0x3d   :  { %716 = vmatprep.subr.bf16.mxu1 %v715_v20  ;;  %v735_v18 = vpack.c.bf16 %v335_v17, %v334_v16 }
  0x3f   :  { %736 = vmatprep.subr.bf16.mxu0 %v735_v18 }
  0x40   :  { %718 = vmatpush3.bf16.msra.mxu1 %v715_v20  ;;  %738 = vmatpush3.bf16.msra.mxu0 %v735_v18  ;;  %v337_v20 = vld [vmem:[#allocation5 + $0x58] sm:$0xff] }
  0xfc   :  { %v640_v21 = vpop.f32.mrb[0].mxu0 }
  0xfd   :  { %v141_v22 = vsel %vm139_vm2, %v640_v21, 0.0  ;;  %v130_v23 = vpop.f32.mrb[1].mxu0 }
  0xfe   :  { %v140_v24 = vsel %vm139_vm2, %v130_v23, 0.0 }
  0xff   :  { %v142_v25 = vadd.f32 %v141_v22, %v140_v24 }
 0x101   :  { %v143_v26 = vrot.slane %v142_v25, 4 }
 0x103   :  { %v144_v27 = vadd.f32 %v143_v26, %v142_v25 }
 0x105   :  { %v145_v28 = vrot.slane %v144_v27, 2 }
 0x107   :  { %v146_v29 = vadd.f32 %v145_v28, %v144_v27 }
 0x109   :  { %v147_v30 = vrot.slane %v146_v29, 1 }
 0x10b   :  { %v148_v31 = vadd.f32 %v147_v30, %v146_v29 }
 0x10d   :  { %v150_v32 = vmul.f32 0.0625, %v148_v31 }
 0x10f   :  { %v151_v33 = vsub.f32 %v130_v23, %v150_v32  ;;  %v152_v34 = vsub.f32 %v640_v21, %v150_v32  ;;  %v739_v21 = vpack.c.bf16 %v337_v20, %v336_v19 }
 0x111   :  { %v153_v35 = vmul.f32 %v151_v33, %v151_v33  ;;  %v154_v36 = vmul.f32 %v152_v34, %v152_v34  ;;  %740 = vmatprep.subr.bf16.mxu0 %v739_v21 }
 0x112   :  { %742 = vmatpush3.bf16.msra.mxu0 %v739_v21 }
 0x113   :  { %v155_v37 = vsel %vm139_vm2, %v153_v35, 0.0  ;;  %v156_v38 = vsel %vm139_vm2, %v154_v36, 0.0 }
 0x114   :  { %v157_v39 = vadd.f32 %v156_v38, %v155_v37 }
 0x116   :  { %v158_v40 = vrot.slane %v157_v39, 4 }
 0x118   :  { %v159_v41 = vadd.f32 %v158_v40, %v157_v39 }
 0x11a   :  { %v160_v42 = vrot.slane %v159_v41, 2 }
 0x11c   :  { %v161_v43 = vadd.f32 %v160_v42, %v159_v41 }
 0x11e   :  { %v162_v44 = vrot.slane %v161_v43, 1 }
 0x120   :  { %v163_v45 = vadd.f32 %v162_v44, %v161_v43 }
 0x122   :  { %v164_v46 = vmul.f32 0.0625, %v163_v45 }
 0x124   :  { %v165_v48 = vadd.f32 1e-05, %v164_v46 }
 0x126   :  { %755 = vrsqrt.f32 %v165_v48 }
 0x130   :  { %v756_v54 = vpop.eup %755 }
 0x131   :  { %v167_v55 = vmul.f32 %v756_v54, %v151_v33  ;;  %v168_v56 = vmul.f32 %v756_v54, %v152_v34 }
 0x133   :  { %v173_v58 = vmul.f32 %v172_v53, %v167_v55  ;;  %v174_v59 = vmul.f32 %v172_v53, %v168_v56  ;;  %v311_v53 = vrot.slane %v948_v51, %v310_v50 }
 0x135   :  { %v179_v60 = vadd.f32 %v178_v57, %v173_v58  ;;  %v180_v61 = vadd.f32 %v178_v57, %v174_v59  ;;  %v317_v57 = vrot.slane %v948_v51, %v316_v52 }
 0x137   :  { %vm181_vm3 = vcmp.ge.f32.partialorder %v179_v60, 0.0  ;;  %v183_v62 = vmul.f32 0.01, %v179_v60  ;;  %vm182_vm4 = vcmp.ge.f32.partialorder %v180_v61, 0.0  ;;  %v184_v63 = vmul.f32 0.01, %v180_v61 }
 0x139   :  { %v185_v0 = vsel %vm181_vm3, %v179_v60, %v183_v62  ;;  %v186_v3 = vsel %vm182_vm4, %v180_v61, %v184_v63 }
 0x13a   :  { %665 = vmatprep.mubr.msk.f32.mxu1 %vm139_vm2, %v185_v0 }
 0x13b   :  { %666 = vmatmul.mubr.msk.f32.vlgmr.msra.gmra.mrb[0].mxu1 %vm139_vm2, %v186_v3 }
 0x20e   :  { %v667_v22 = vpop.f32.mrb[0].mxu1 }
 0x20f   :  { %v281_v23 = vsel %vm139_vm2, %v667_v22, 0.0  ;;  %v271_v24 = vpop.f32.mrb[1].mxu1 }
 0x210   :  { %v280_v25 = vsel %vm139_vm2, %v271_v24, 0.0 }
 0x211   :  { %v282_v26 = vadd.f32 %v281_v23, %v280_v25 }
 0x213   :  { %v283_v27 = vrot.slane %v282_v26, 4 }
 0x215   :  { %v284_v28 = vadd.f32 %v283_v27, %v282_v26 }
 0x217   :  { %v285_v29 = vrot.slane %v284_v28, 2 }
 0x219   :  { %v286_v30 = vadd.f32 %v285_v29, %v284_v28 }
 0x21b   :  { %v287_v31 = vrot.slane %v286_v30, 1 }
 0x21d   :  { %v288_v32 = vadd.f32 %v287_v31, %v286_v30  ;;  %v459_v30 = vsub.s32 6, %v942_v49 }
 0x21f   :  { %v289_v33 = vmul.f32 0.0625, %v288_v32 }
 0x221   :  { %v290_v34 = vsub.f32 %v271_v24, %v289_v33  ;;  %v291_v35 = vsub.f32 %v667_v22, %v289_v33 }
 0x223   :  { %v292_v36 = vmul.f32 %v290_v34, %v290_v34  ;;  %v293_v37 = vmul.f32 %v291_v35, %v291_v35 }
 0x225   :  { %v294_v38 = vsel %vm139_vm2, %v292_v36, 0.0  ;;  %v295_v39 = vsel %vm139_vm2, %v293_v37, 0.0 }
 0x226   :  { %v296_v40 = vadd.f32 %v295_v39, %v294_v38 }
 0x228   :  { %v297_v41 = vrot.slane %v296_v40, 4 }
 0x22a   :  { %v298_v42 = vadd.f32 %v297_v41, %v296_v40 }
 0x22c   :  { %v299_v43 = vrot.slane %v298_v42, 2 }
 0x22e   :  { %v300_v44 = vadd.f32 %v299_v43, %v298_v42 }
 0x230   :  { %v301_v45 = vrot.slane %v300_v44, 1 }
 0x232   :  { %v302_v46 = vadd.f32 %v301_v45, %v300_v44 }
 0x234   :  { %v303_v47 = vmul.f32 0.0625, %v302_v46 }
 0x236   :  { %v304_v48 = vadd.f32 1e-05, %v303_v47 }
 0x238   :  { %757 = vrsqrt.f32 %v304_v48 }
 0x242   :  { %v758_v54 = vpop.eup %757 }
 0x243   :  { %v306_v55 = vmul.f32 %v758_v54, %v290_v34  ;;  %v307_v56 = vmul.f32 %v758_v54, %v291_v35  ;;  %v460_v34 = vrot.slane %v948_v51, %v459_v30 }
 0x245   :  { %v312_v58 = vmul.f32 %v311_v53, %v306_v55  ;;  %v313_v59 = vmul.f32 %v311_v53, %v307_v56 }
 0x247   :  { %v318_v60 = vadd.f32 %v317_v57, %v312_v58  ;;  %v319_v61 = vadd.f32 %v317_v57, %v313_v59 }
 0x249   :  { %vm320_vm5 = vcmp.ge.f32.partialorder %v318_v60, 0.0  ;;  %v322_v62 = vmul.f32 0.01, %v318_v60  ;;  %vm321_vm6 = vcmp.ge.f32.partialorder %v319_v61, 0.0  ;;  %v323_v63 = vmul.f32 0.01, %v319_v61 }
 0x24b   :  { %v324_v0 = vsel %vm320_vm5, %v318_v60, %v322_v62  ;;  %v325_v3 = vsel %vm321_vm6, %v319_v61, %v323_v63 }
 0x24c   :  { %692 = vmatprep.mubr.msk.f32.mxu0 %vm139_vm2, %v324_v0 }
 0x24d   :  { %693 = vmatmul.mubr.msk.f32.vlgmr.msra.gmra.mrb[2].mxu0 %vm139_vm2, %v325_v3 }
 0x320   :  { %v694_v6 = vpop.f32.mrb[2].mxu0 }
 0x321   :  { %v414_v7 = vpop.f32.mrb[3].mxu0  ;;  %v972_v9 = vadd.f32 %v694_v6, %v341_v5  ;;  %v489_v6 = vsub.s32 7, %v942_v49 }
 0x322   :  { %v967_v8 = vadd.f32 %v414_v7, %v341_v5 }
 0x323   :  { %v490_v7 = vrot.slane %v948_v51, %v489_v6 }
 0x324   :  { %513 = vrot.lane.b32.xlu1 %v967_v8, %s855_s3  ;;  %429 = vrot.lane.b32.xlu0 %v967_v8, %s856_s4 }
 0x328   :  { %515 = vrot.lane.b32.xlu1 %v972_v9, %s855_s3  ;;  %431 = vrot.lane.b32.xlu0 %v972_v9, %s856_s4 }
 0x396   :  { %v514_v12 = vpop.permute.xlu1 %513  ;;  %v430_v13 = vpop.permute.xlu0 %429 }
 0x397   :  { %v980_v14 = vmul.f32 %v514_v12, %v967_v8  ;;  %v435_v15 = vsub.f32 %v426_v11, %v430_v13 }
 0x399   :  { %v439_v16 = vand.u32 2147483647, %v435_v15  ;;  %523 = vrot.lane.b32.xlu0 %v980_v14, %s857_s24  ;;  %v437_v32 = vmax.f32 %v435_v15, 0.0 }
 0x39a   :  { %v516_v17 = vpop.permute.xlu1 %515  ;;  %v432_v18 = vpop.permute.xlu0 %431 }
 0x39b   :  { %v441_v19 = vsub.f32 0.0, %v439_v16  ;;  %v984_v20 = vmul.f32 %v516_v17, %v972_v9  ;;  %v436_v21 = vsub.f32 %v426_v11, %v432_v18 }
 0x39d   :  { %v443_v22 = vmul.f32 1.442695, %v441_v19  ;;  %v440_v23 = vand.u32 2147483647, %v436_v21  ;;  %525 = vrot.lane.b32.xlu1 %v984_v20, %s857_s24  ;;  %531 = vrot.lane.b32.xlu0 %v980_v14, %s858_s25  ;;  %v438_v38 = vmax.f32 %v436_v21, 0.0 }
 0x39f   :  { %759 = vpow2.f32 %v443_v22  ;;  %v442_v24 = vsub.f32 0.0, %v440_v23 }
 0x3a1   :  { %v445_v25 = vmul.f32 1.442695, %v442_v24  ;;  %533 = vrot.lane.b32.xlu1 %v984_v20, %s858_s25 }
 0x3a3   :  { %761 = vpow2.f32 %v445_v25 }
 0x3a9   :  { %v760_v26 = vpop.eup %759 }
 0x3aa   :  { %v447_v27 = vadd.f32 1.0, %v760_v26 }
 0x3ac   :  { %763 = vlog2.f32 %v447_v27 }
 0x3ad   :  { %v762_v28 = vpop.eup %761 }
 0x3ae   :  { %v448_v29 = vadd.f32 1.0, %v762_v28 }
 0x3b0   :  { %765 = vlog2.f32 %v448_v29 }
 0x3b6   :  { %v764_v31 = vpop.eup %763 }
 0x3b7   :  { %v450_v33 = vmul.f32 0.6931472, %v764_v31 }
 0x3b9   :  { %v453_v35 = vadd.f32 %v450_v33, %v437_v32 }
 0x3ba   :  { %v766_v36 = vpop.eup %765 }
 0x3bb   :  { %v455_v37 = vsub.f32 %v426_v11, %v453_v35  ;;  %v452_v39 = vmul.f32 0.6931472, %v766_v36 }
 0x3bd   :  { %v461_v40 = vsub.f32 %v455_v37, %v460_v34  ;;  %v454_v41 = vadd.f32 %v452_v39, %v438_v38 }
 0x3bf   :  { %v465_v42 = vand.u32 2147483647, %v461_v40  ;;  %v456_v43 = vsub.f32 %v426_v11, %v454_v41  ;;  %v463_v57 = vmax.f32 %v461_v40, 0.0  ;;  %v541_v40 = vadd.f32 %v967_v8, %v929_v1 }
 0x3c1   :  { %v467_v44 = vsub.f32 0.0, %v465_v42  ;;  %v462_v45 = vsub.f32 %v456_v43, %v460_v34  ;;  %v543_v41 = vmax.f32 %v541_v40, 0.0  ;;  %v542_v42 = vadd.f32 %v972_v9, %v934_v2 }
 0x3c3   :  { %v469_v46 = vmul.f32 1.442695, %v467_v44  ;;  %v466_v47 = vand.u32 2147483647, %v462_v45  ;;  %v464_v62 = vmax.f32 %v462_v45, 0.0  ;;  %v545_v44 = vmin.f32 %v543_v41, 1.0 }
 0x3c4   :  { %v544_v45 = vmax.f32 %v542_v42, 0.0 }
 0x3c5   :  { %767 = vpow2.f32 %v469_v46  ;;  %v468_v48 = vsub.f32 0.0, %v466_v47 }
 0x3c7   :  { %v471_v50 = vmul.f32 1.442695, %v468_v48 }
 0x3c9   :  { %769 = vpow2.f32 %v471_v50 }
 0x3cf   :  { %v768_v52 = vpop.eup %767 }
 0x3d0   :  { %v473_v53 = vadd.f32 1.0, %v768_v52  ;;  %v546_v52 = vmin.f32 %v544_v45, 1.0 }
 0x3d2   :  { %771 = vlog2.f32 %v473_v53 }
 0x3d3   :  { %v770_v54 = vpop.eup %769 }
 0x3d4   :  { %v474_v55 = vadd.f32 1.0, %v770_v54 }
 0x3d6   :  { %773 = vlog2.f32 %v474_v55 }
 0x3dc   :  { %v772_v56 = vpop.eup %771 }
 0x3dd   :  { %v476_v58 = vmul.f32 0.6931472, %v772_v56 }
 0x3df   :  { %v479_v59 = vadd.f32 %v476_v58, %v463_v57 }
 0x3e0   :  { %v774_v60 = vpop.eup %773 }
 0x3e1   :  { %v481_v61 = vadd.f32 %v479_v59, %v460_v34  ;;  %v478_v63 = vmul.f32 0.6931472, %v774_v60 }
 0x3e3   :  { %v483_v0 = vmul.f32 1.442695, %v481_v61  ;;  %v480_v3 = vadd.f32 %v478_v63, %v464_v62 }
 0x3e5   :  { %v482_v4 = vadd.f32 %v480_v3, %v460_v34  ;;  %775 = vpow2.f32 %v483_v0 }
 0x3e7   :  { %v485_v5 = vmul.f32 1.442695, %v482_v4 }
 0x3e9   :  { %777 = vpow2.f32 %v485_v5 }
 0x3ef   :  { %v776_v10 = vpop.eup %775 }
 0x3f0   :  { %v491_v11 = vmul.f32 %v776_v10, %v490_v7 }
 0x3f2   :  { %495 = vrot.lane.b32.xlu0 %v491_v11, %s856_s4 }
 0x3f3   :  { %v778_v12 = vpop.eup %777 }
 0x3f4   :  { %v492_v13 = vmul.f32 %v778_v12, %v490_v7 }
 0x3f6   :  { %503 = vrot.lane.b32.xlu0 %v491_v11, %s859_s26  ;;  %497 = vrot.lane.b32.xlu1 %v492_v13, %s856_s4 }
 0x3fa   :  { %505 = vrot.lane.b32.xlu1 %v492_v13, %s859_s26 }
 0x40b   :  { %v524_v15 = vpop.permute.xlu0 %523 }
 0x40c   :  { %v529_v16 = vadd.f32 %v524_v15, %v980_v14 }
 0x40f   :  { %v526_v17 = vpop.permute.xlu1 %525  ;;  %v532_v18 = vpop.permute.xlu0 %531 }
 0x410   :  { %v537_v49 = vadd.f32 %v532_v18, %v529_v16  ;;  %v530_v19 = vadd.f32 %v526_v17, %v984_v20 }
 0x412   :  { %v539_v51 = vmul.f32 0.5, %v537_v49 }
 0x413   :  { %v534_v21 = vpop.permute.xlu1 %533 }
 0x414   :  { %v547_v22 = vmax.f32 %v539_v51, 1e-06  ;;  %v538_v23 = vadd.f32 %v534_v21, %v530_v19 }
 0x416   :  { %v549_v24 = vmin.f32 %v547_v22, 1.0  ;;  %v540_v25 = vmul.f32 0.5, %v538_v23 }
 0x418   :  { %v548_v26 = vmax.f32 %v540_v25, 1e-06  ;;  %557 = vrot.lane.b32.xlu0 %v549_v24, %s860_s27 }
 0x41a   :  { %v550_v27 = vmin.f32 %v548_v26, 1.0 }
 0x41c   :  { %559 = vrot.lane.b32.xlu1 %v550_v27, %s860_s27 }
 0x464   :  { %v496_v28 = vpop.permute.xlu0 %495 }
 0x465   :  { %v501_v29 = vadd.f32 %v496_v28, %v491_v11 }
 0x468   :  { %v498_v30 = vpop.permute.xlu1 %497  ;;  %v504_v14 = vpop.permute.xlu0 %503 }
 0x469   :  { %v509_v31 = vadd.f32 %v504_v14, %v501_v29  ;;  %v502_v32 = vadd.f32 %v498_v30, %v492_v13 }
 0x46b   :  { %v511_v33 = vmul.f32 0.33333334, %v509_v31 }
 0x46c   :  { %v506_v34 = vpop.permute.xlu1 %505 }
 0x46d   :  { %v551_v20 = vmax.f32 %v511_v33, 1e-06  ;;  %v510_v35 = vadd.f32 %v506_v34, %v502_v32 }
 0x46f   :  { %v553_v36 = vmin.f32 %v551_v20, 1.0  ;;  %v512_v37 = vmul.f32 0.33333334, %v510_v35 }
 0x471   :  { %v552_v38 = vmax.f32 %v512_v37, 1e-06  ;;  %565 = vrot.lane.b32.xlu0 %v553_v36, %s861_s30 }
 0x473   :  { %v554_v39 = vmin.f32 %v552_v38, 1.0 }
 0x475   :  { %567 = vrot.lane.b32.xlu1 %v554_v39, %s861_s30 }
 0x48a   :  { %v558_v43 = vpop.permute.xlu0 %557 }
 0x48b   :  { %v572_v46 = vsel %vm571_vm7, %v545_v44, %v558_v43 }
 0x48e   :  { %v560_v47 = vpop.permute.xlu1 %559 }
 0x48f   :  { %v573_v53 = vsel %vm571_vm7, %v546_v52, %v560_v47 }
 0x4e3   :  { %v566_v48 = vpop.permute.xlu0 %565 }
 0x4e4   :  { %v575_v50 = vsel %vm574_vm8, %v572_v46, %v566_v48 }
 0x4e5   :  { %578 = vst.msk [vmem:[#allocation7] sm:$0xff] %vm577_vm9, %v575_v50 }
 0x4e7   :  { %v568_v1 = vpop.permute.xlu1 %567 }
 0x4e8   :  { %v576_v8 = vsel %vm574_vm8, %v573_v53, %v568_v1 }
 0x4e9   :  { %579 = vst.msk [vmem:[#allocation7 + $0x8] sm:$0xff] %vm577_vm9, %v576_v8 }
 0x4ea   :  { %834 = shalt.err (!%p831_p6)
}
 0x4eb   :  { %s835_s11 = scalar_lea.hbm %s1021_s5, 256 }
 0x4ec   :  { %p836_p7 = scmp.ne.s32.totalorder %s1021_s5, %s835_s11  ;;  %p839_p8 = scmp.lt.u32.totalorder %s835_s11, %s1021_s5 }
 0x4ee   :  { %p841_p9 = pnand %p839_p8, %p836_p7 }
 0x4f0   :  { %844 = shalt.err (!%p841_p9)
}
 0x4f1   :  { %591 = dma.vmem_to_hbm [thread:$0]  %s586_s7, 256, %s1021_s5, [#allocation4], %s852_s28, %s852_s28, %s853_s29  }
 0x4f2   :  { %849 = dma.done.wait [#allocation4], 256  }
 0x4f3   :  { %850 = vsyncadd [#allocation4], 4294967040 }
 0x4f4   :  { %595 = vsyncpa [#allocation3], 1 }
 0x4f5   :  { %596 = vsyncpa [#allocation6], 1 }
 0x4f6   :  { %597 = vsyncpa [#allocation4], 1 }

</bundles_post_ra>
